<compile_context>
chip_gen: v6e
topology: v6e:2x2x1
jax: 0.10.0
libtpu: 0.0.40
codegen_flags: <defaults>
</compile_context>

<pallas_src>
import math

import jax
import jax.numpy as jnp
from jax.experimental import pallas as pl
from jax.experimental.pallas import tpu as pltpu

# Model hyper-parameters (defaults from the PyTorch module).
N_CLUSTERS = 10
HIDDEN = 10
ALPHA = 1.0

# Synthetic input sizes (small, consistent with a dense encoder).
BATCH = 8
D_IN = 32

_LANE = 128          # TPU lane width
_PAD_BIG = 1e30      # large finite constant masking padded cluster columns


def _round_up(x, m):
    return (x + m - 1) // m * m


def _make_dec_kernel(alpha):
    """Kernel factory: alpha is a static Python constant."""
    power = float(alpha + 1.0) / 2.0
    inv_alpha = 1.0 / float(alpha)

    def kernel(x_ref, w_ref, b_ref, ct_ref, cn_ref, q_ref):
        # x_ref : (TB, D_IN)        input tile (streamed)
        # w_ref : (D_IN, H_PAD)     encoder weight              (resident)
        # b_ref : (1, H_PAD)        encoder bias                (resident)
        # ct_ref: (H_PAD, K_PAD)    (-2/alpha) * centers^T, f32 (resident)
        # cn_ref: (1, K_PAD)        1 + ||c_j||^2/alpha, padded cols = 1e30
        # q_ref : (TB, K_PAD)       soft assignments (padded cols ~ 0)

        # --- autoencoder.encode (synthetic dense encoder), on the MXU ------
        h = jnp.dot(x_ref[...], w_ref[...], preferred_element_type=jnp.float32)
        h = h + b_ref[...]                                     # (TB, H_PAD) f32

        # --- 1 + ||h-c||^2/alpha via the matmul identity (all-f32 terms) ---
        hc = jnp.dot(h, ct_ref[...],
                     preferred_element_type=jnp.float32)       # (TB, K_PAD)
        h_sq = jnp.sum(h * h, axis=1, keepdims=True)           # (TB, 1)
        t = h_sq * inv_alpha + cn_ref[...] + hc                # (TB, K_PAD)
        # Clamp: cancellation can yield t slightly below 1 (norm_sq < 0).
        t = jnp.maximum(t, 1.0)

        # --- Student-t numerator (EUP approximate reciprocal) --------------
        num = pl.reciprocal(t, approx=True)
        if power != 1.0:  # static branch; power == 1.0 for alpha == 1.0
            num = num ** power
        # Padded columns: t ~ 1e30 -> num ~ 1e-30, negligible in the row sum.

        # --- row-normalize (exact reciprocal on the (TB,1) row sums) -------
        denom = jnp.sum(num, axis=1, keepdims=True)            # (TB, 1)
        q = num * pl.reciprocal(denom, approx=False)
        q_ref[...] = q.astype(q_ref.dtype)

    return kernel


def dec_forward(x, w_enc, b_enc, centers, *, alpha=ALPHA, block_b=2048,
                matmul_dtype=jnp.float32, out_dtype=jnp.float32,
                slice_output=True):
    """DEC forward: encode -> Student-t soft cluster assignment.

    Batch is tiled with a parallel 1-D grid; feature / cluster axes are
    zero-padded to the 128-lane width.  The scalar constants and the padded-
    cluster mask are folded into the small resident operands in this wrapper.

    matmul_dtype : dtype for the streamed x / encoder weight (bf16 on v6e/v7x
                   halves the x HBM read; the distance matmul stays f32).
    out_dtype    : q storage dtype (bf16 halves writeback if the consumer,
                   e.g. target_distribution, tolerates it).
    slice_output : if False, return the (B_pad, K_pad) array and let the
                   consumer fuse the [:B, :K] slice under jit (avoids an
                   extra HBM pass over q).
    """
    B, D = x.shape
    K, H = centers.shape

    H_pad = _round_up(H, _LANE)
    K_pad = _round_up(K, _LANE)

    f32 = jnp.float32
    inv_alpha = 1.0 / float(alpha)

    # --- batch tiling -----------------------------------------------------
    # sublane alignment: 8 rows for f32 tiles, 16 for 2-byte streamed x.
    sub = 16 if jnp.dtype(matmul_dtype).itemsize == 2 else 8
    B_a = _round_up(B, sub)
    n_steps = pl.cdiv(B_a, int(block_b))
    if B_a >= 2 * sub:
        # v7x has 2 TensorCores: make sure the "parallel" axis has >=2 steps.
        n_steps = max(n_steps, 2)
    TB = _round_up(pl.cdiv(B_a, n_steps), sub)
    B_pad = n_steps * TB          # pads at most ~sub-1 rows per grid step

    # --- pad / fold params (once per call; tiny resident arrays) -----------
    if B_pad == B:
        x_p = x.astype(matmul_dtype)
    else:
        x_p = jnp.pad(x.astype(f32), ((0, B_pad - B), (0, 0))).astype(matmul_dtype)
    w_p = jnp.pad(w_enc.astype(f32), ((0, 0), (0, H_pad - H))).astype(matmul_dtype)
    b_p = jnp.pad(b_enc.astype(f32).reshape(1, H), ((0, 0), (0, H_pad - H)))
    c_p = jnp.pad(centers.astype(f32), ((0, K_pad - K), (0, H_pad - H)))
    # (-2/alpha) * centers^T, kept in f32 (distance matmul stays f32).
    ct_p = (c_p.T * jnp.asarray(-2.0 * inv_alpha, f32))        # (H_pad, K_pad)
    # cn' = 1 + ||c||^2/alpha; padded columns get a large FINITE constant so
    # their numerator underflows to ~0 (no in-kernel masking needed).
    cn_p = 1.0 + jnp.sum(c_p * c_p, axis=1) * inv_alpha        # (K_pad,)
    col = jnp.arange(K_pad)
    cn_p = jnp.where(col < K, cn_p, jnp.asarray(_PAD_BIG, f32)).reshape(1, K_pad)

    grid = (n_steps,)

    # Rough per-step VMEM budget (double-buffered tiles + resident params +
    # intermediates), with 2x headroom; clamped to 32 MiB so it also leaves
    # headroom inside v7x's 64 MiB physical VMEM.
    in_item = jnp.dtype(matmul_dtype).itemsize
    out_item = jnp.dtype(out_dtype).itemsize
    vmem_est = (2 * TB * D * in_item                      # x tiles (dbl-buf)
                + D * H_pad * in_item + H_pad * K_pad * 4  # W, scaled centers^T
                + (H_pad + K_pad) * 4                      # bias, cn'
                + 2 * TB * K_pad * out_item                # q tiles (dbl-buf)
                + (TB * H_pad + 3 * TB * K_pad) * 4)       # in-kernel temps
    vmem_limit = int(min(max(2 * vmem_est, 8 << 20), 32 << 20))

    kernel = _make_dec_kernel(alpha)

    q_pad = pl.pallas_call(
        kernel,
        out_shape=jax.ShapeDtypeStruct((B_pad, K_pad), out_dtype),
        grid=grid,
        in_specs=[
            pl.BlockSpec((TB, D), lambda i: (i, 0)),         # x: batch-tiled
            pl.BlockSpec((D, H_pad), lambda i: (0, 0)),      # W: resident
            pl.BlockSpec((1, H_pad), lambda i: (0, 0)),      # b: resident
            pl.BlockSpec((H_pad, K_pad), lambda i: (0, 0)),  # scaled c^T: resident
            pl.BlockSpec((1, K_pad), lambda i: (0, 0)),      # cn': resident
        ],
        out_specs=pl.BlockSpec((TB, K_pad), lambda i: (i, 0)),
        compiler_params=pltpu.CompilerParams(
            dimension_semantics=("parallel",),   # shards batch across TCs (v7x)
            vmem_limit_bytes=vmem_limit,
        ),
    )(x_p, w_p, b_p, ct_p, cn_p)

    if not slice_output:
        return q_pad            # caller fuses the [:B, :K] slice under jit
    return q_pad[:B, :K]


def _dec_reference(x, w_enc, b_enc, centers, alpha=ALPHA):
    """Pure-JAX reference matching the PyTorch module semantics."""
    h = x @ w_enc + b_enc                                   # encode
    diff = h[:, None, :] - centers[None, :, :]
    norm_sq = jnp.sum(diff * diff, axis=2)
    num = 1.0 / (1.0 + norm_sq / alpha)
    power = float(alpha + 1.0) / 2.0
    num = num ** power
    return num / jnp.sum(num, axis=1, keepdims=True)


def _xavier_uniform(key, shape):
    """Matches torch.nn.init.xavier_uniform_ for a 2-D tensor (gain=1)."""
    fan_out, fan_in = shape[0], shape[1]
    bound = math.sqrt(6.0 / (fan_in + fan_out))
    return jax.random.uniform(key, shape, minval=-bound, maxval=bound,
                              dtype=jnp.float32)


if __name__ == "__main__":
    key = jax.random.PRNGKey(0)
    k_x, k_w, k_c = jax.random.split(key, 3)

    # Deterministic synthetic parameters (small demo shapes).
    x = jax.random.normal(k_x, (BATCH, D_IN), dtype=jnp.float32)
    w_enc = _xavier_uniform(k_w, (D_IN, HIDDEN))          # synthetic encoder weight
    b_enc = jnp.zeros((1, HIDDEN), dtype=jnp.float32)     # synthetic encoder bias
    centers = _xavier_uniform(k_c, (N_CLUSTERS, HIDDEN))  # ClusteringLayer.cluster_centers

    q = dec_forward(x, w_enc, b_enc, centers)
    q = jax.block_until_ready(q)

    # Sanity checks: shape, row-stochasticity, and agreement with the
    # pure-JAX reference (tolerance covers the EUP approximate reciprocal).
    assert q.shape == (BATCH, N_CLUSTERS), q.shape
    assert bool(jnp.all(jnp.abs(jnp.sum(q, axis=1) - 1.0) < 1e-5))
    q_ref = _dec_reference(x, w_enc, b_enc, centers)
    assert bool(jnp.all(jnp.abs(q - q_ref) < 2e-3)), float(jnp.max(jnp.abs(q - q_ref)))

    print("KERNEL_OK")
</pallas_src>

<mosaic_0001>
module attributes {stable_mosaic.version = 11 : i64} {
  func.func @kernel(%arg0: i32, %arg1: memref<8x32xf32, #tpu.memory_space<vmem>>, %arg2: memref<32x128xf32, #tpu.memory_space<vmem>>, %arg3: memref<1x128xf32, #tpu.memory_space<vmem>>, %arg4: memref<128x128xf32, #tpu.memory_space<vmem>>, %arg5: memref<1x128xf32, #tpu.memory_space<vmem>>, %arg6: memref<8x128xf32, #tpu.memory_space<vmem>>) attributes {dimension_semantics = [#tpu.dimension_semantics<parallel>], iteration_bounds = array<i64: 1>, scalar_prefetch = 0 : i64, scratch_operands = 0 : i64, tpu.core_type = #tpu.core_type<tc>, window_params = [{transform_indices = @transform_0, window_bounds = array<i64: 8, 32>}, {pipeline_mode = #tpu.pipeline_mode<synchronous>, transform_indices = @transform_1, window_bounds = array<i64: 32, 128>}, {pipeline_mode = #tpu.pipeline_mode<synchronous>, transform_indices = @transform_2, window_bounds = array<i64: 1, 128>}, {pipeline_mode = #tpu.pipeline_mode<synchronous>, transform_indices = @transform_3, window_bounds = array<i64: 128, 128>}, {pipeline_mode = #tpu.pipeline_mode<synchronous>, transform_indices = @transform_4, window_bounds = array<i64: 1, 128>}, {transform_indices = @transform_5, window_bounds = array<i64: 8, 128>}]} {
    %c0 = arith.constant 0 : index
    %c0_0 = arith.constant 0 : index
    %0 = vector.load %arg1[%c0, %c0_0] : memref<8x32xf32, #tpu.memory_space<vmem>>, vector<8x32xf32>
    %c0_1 = arith.constant 0 : index
    %c0_2 = arith.constant 0 : index
    %1 = vector.load %arg2[%c0_1, %c0_2] : memref<32x128xf32, #tpu.memory_space<vmem>>, vector<32x128xf32>
    %cst = arith.constant dense<0.000000e+00> : vector<8x128xf32>
    %2 = tpu.matmul %0, %1, %cst {dimension_numbers = #tpu.dot_dimension_numbers<[1], [0], [0], [1], [0, 0, 1, 1], [], []>} : vector<8x32xf32>, vector<32x128xf32>, vector<8x128xf32> -> vector<8x128xf32>
    %c0_3 = arith.constant 0 : index
    %c0_4 = arith.constant 0 : index
    %3 = vector.load %arg3[%c0_3, %c0_4] : memref<1x128xf32, #tpu.memory_space<vmem>>, vector<1x128xf32>
    %4 = vector.broadcast %3 : vector<1x128xf32> to vector<8x128xf32>
    %5 = arith.addf %2, %4 : vector<8x128xf32>
    %c0_5 = arith.constant 0 : index
    %c0_6 = arith.constant 0 : index
    %6 = vector.load %arg4[%c0_5, %c0_6] : memref<128x128xf32, #tpu.memory_space<vmem>>, vector<128x128xf32>
    %cst_7 = arith.constant dense<0.000000e+00> : vector<8x128xf32>
    %7 = tpu.matmul %5, %6, %cst_7 {dimension_numbers = #tpu.dot_dimension_numbers<[1], [0], [0], [1], [0, 0, 1, 1], [], []>} : vector<8x128xf32>, vector<128x128xf32>, vector<8x128xf32> -> vector<8x128xf32>
    %8 = arith.mulf %5, %5 : vector<8x128xf32>
    %cst_8 = arith.constant dense<0.000000e+00> : vector<8xf32>
    %9 = vector.multi_reduction <add>, %8, %cst_8 [1] : vector<8x128xf32> to vector<8xf32>
    %10 = vector.shape_cast %9 : vector<8xf32> to vector<8x1xf32>
    %cst_9 = arith.constant 1.000000e+00 : f32
    %11 = vector.broadcast %cst_9 : f32 to vector<8x1xf32>
    %12 = arith.mulf %10, %11 : vector<8x1xf32>
    %c0_10 = arith.constant 0 : index
    %c0_11 = arith.constant 0 : index
    %13 = vector.load %arg5[%c0_10, %c0_11] : memref<1x128xf32, #tpu.memory_space<vmem>>, vector<1x128xf32>
    %14 = vector.broadcast %12 : vector<8x1xf32> to vector<8x128xf32>
    %15 = vector.broadcast %13 : vector<1x128xf32> to vector<8x128xf32>
    %16 = arith.addf %14, %15 : vector<8x128xf32>
    %17 = arith.addf %16, %7 : vector<8x128xf32>
    %cst_12 = arith.constant 1.000000e+00 : f32
    %18 = vector.broadcast %cst_12 : f32 to vector<8x128xf32>
    %19 = arith.maximumf %17, %18 : vector<8x128xf32>
    %20 = tpu.reciprocal %19 {approx = true} : vector<8x128xf32> -> vector<8x128xf32>
    %cst_13 = arith.constant dense<0.000000e+00> : vector<8xf32>
    %21 = vector.multi_reduction <add>, %20, %cst_13 [1] : vector<8x128xf32> to vector<8xf32>
    %22 = vector.shape_cast %21 : vector<8xf32> to vector<8x1xf32>
    %23 = tpu.reciprocal %22 : vector<8x1xf32> -> vector<8x1xf32>
    %24 = vector.broadcast %23 : vector<8x1xf32> to vector<8x128xf32>
    %25 = arith.mulf %20, %24 : vector<8x128xf32>
    %c0_14 = arith.constant 0 : index
    %c0_15 = arith.constant 0 : index
    %26 = vector.load %arg6[%c0_14, %c0_15] : memref<8x128xf32, #tpu.memory_space<vmem>>, vector<8x128xf32>
    tpu.vector_store %arg6[%c0_14, %c0_15], %25 {strides = array<i32>} : memref<8x128xf32, #tpu.memory_space<vmem>>, vector<8x128xf32>,
    return
  }
  func.func @transform_0(%arg0: i32) -> (i32, i32) {
    %c0_i32 = arith.constant 0 : i32
    %c0_i32_0 = arith.constant 0 : i32
    return %arg0, %c0_i32 : i32, i32
  }
  func.func @transform_1(%arg0: i32) -> (i32, i32) {
    %c0_i32 = arith.constant 0 : i32
    %c0_i32_0 = arith.constant 0 : i32
    %c0_i32_1 = arith.constant 0 : i32
    return %c0_i32, %c0_i32_0 : i32, i32
  }
  func.func @transform_2(%arg0: i32) -> (i32, i32) {
    %c0_i32 = arith.constant 0 : i32
    %c0_i32_0 = arith.constant 0 : i32
    %c0_i32_1 = arith.constant 0 : i32
    return %c0_i32, %c0_i32_0 : i32, i32
  }
  func.func @transform_3(%arg0: i32) -> (i32, i32) {
    %c0_i32 = arith.constant 0 : i32
    %c0_i32_0 = arith.constant 0 : i32
    %c0_i32_1 = arith.constant 0 : i32
    return %c0_i32, %c0_i32_0 : i32, i32
  }
  func.func @transform_4(%arg0: i32) -> (i32, i32) {
    %c0_i32 = arith.constant 0 : i32
    %c0_i32_0 = arith.constant 0 : i32
    %c0_i32_1 = arith.constant 0 : i32
    return %c0_i32, %c0_i32_0 : i32, i32
  }
  func.func @transform_5(%arg0: i32) -> (i32, i32) {
    %c0_i32 = arith.constant 0 : i32
    %c0_i32_0 = arith.constant 0 : i32
    return %arg0, %c0_i32 : i32, i32
  }
}

</mosaic_0001>

<bundles_post_ra>
// kernel: tpu_custom_call.1
= control target key start
LH: loop header
LB: loop body
LE: loop exit
PB: predicated region body
PF: predicated region fallthrough
CT: control target
= control target key end

     0   :  { %10 = vsyncpa [#allocation3], 0  ;;  %s514_s0 = inlined_call_operand.hbm [shape: f32[8,32], index: 0, kind: input, shape index: {}]   ;;  %s515_s1 = inlined_call_operand.hbm [shape: f32[32,128], index: 1, kind: input, shape index: {}]   ;;  %s516_s2 = inlined_call_operand.vmem [shape: f32[1,128], index: 2, kind: input, shape index: {}]   ;;  %s517_s3 = inlined_call_operand.hbm [shape: f32[128,128], index: 3, kind: input, shape index: {}]   ;;  %s518_s4 = inlined_call_operand.vmem [shape: f32[1,128], index: 4, kind: input, shape index: {}]   ;;  %s519_s5 = inlined_call_operand.hbm [shape: f32[8,128], index: 5, kind: output, shape index: {}]  }
   0x1   :  { %11 = vsyncpa [#allocation6], 0 }
   0x2   :  { %12 = vsyncpa [#allocation4], 0  ;;  %s436_s18 = smov [#allocation5]  }
   0x3   :  { %s28_s19 = sshll.u32 %s436_s18, 4  ;;  %s29_s19 = int_to_ptr.vmem [resolvable:$true] %s28_s19 }
   0x4   :  { %s358_s20 = scalar_lea.vmem %s29_s19, 512  ;;  %p363_p1 = scmp.lt.s32.totalorder %s29_s19, %s29_s19 }
   0x5   :  { %p359_p0 = scmp.ne.s32.totalorder %s29_s19, %s358_s20  ;;  %p364_p2 = scmp.lt.s32.totalorder %s358_s20, %s358_s20 }
   0x7   :  { %p365_p3 = por %p364_p2, %p363_p1 }
   0x9   :  { %p366_p4 = pnand %p365_p3, %p359_p0 }
   0xb   :  { %369 = shalt.err (!%p366_p4)
}
   0xc   :  { %s437_s21 = smov 128   ;;  %s438_s22 = smov 8  }
   0xd   :  { %34 = dma.hbm_to_vmem [thread:$0]  %s515_s1, 512, %s29_s19, [#allocation6], %s437_s21, %s437_s21, %s438_s22  }
   0xe   :  { %s439_s25 = smov [#allocation2]   ;;  %s440_s27 = smov [#allocation7]  }
   0xf   :  { %s19_s26 = sshll.u32 %s439_s25, 4  ;;  %s42_s28 = sshll.u32 %s440_s27, 4  ;;  %s20_s26 = int_to_ptr.vmem [resolvable:$true] %s19_s26  ;;  %s43_s28 = int_to_ptr.vmem [resolvable:$true] %s42_s28 }
  0x10   :  { %s378_s29 = scalar_lea.vmem %s20_s26, 128  ;;  %p383_p6 = scmp.lt.s32.totalorder %s20_s26, %s20_s26 }
  0x11   :  { %p379_p5 = scmp.ne.s32.totalorder %s20_s26, %s378_s29  ;;  %p384_p7 = scmp.lt.s32.totalorder %s378_s29, %s378_s29 }
  0x13   :  { %p385_p8 = por %p384_p7, %p383_p6 }
  0x15   :  { %p386_p9 = pnand %p385_p8, %p379_p5 }
  0x17   :  { %389 = shalt.err (!%p386_p9)
}
  0x18   :  { %22 = dma.hbm_to_vmem [thread:$0]  %s514_s0, 128, %s20_s26, [#allocation3]  }
  0x19   :  { %s398_s7 = scalar_lea.vmem %s43_s28, 2048  ;;  %p403_p11 = scmp.lt.s32.totalorder %s43_s28, %s43_s28 }
  0x1a   :  { %p399_p10 = scmp.ne.s32.totalorder %s43_s28, %s398_s7  ;;  %p404_p12 = scmp.lt.s32.totalorder %s398_s7, %s398_s7 }
  0x1c   :  { %p405_p13 = por %p404_p12, %p403_p11 }
  0x1e   :  { %p406_p0 = pnand %p405_p13, %p399_p10 }
  0x20   :  { %409 = shalt.err (!%p406_p0)
}
  0x21   :  { %48 = dma.hbm_to_vmem [thread:$0]  %s517_s3, 2048, %s43_s28, [#allocation6], %s437_s21, %s437_s21, %s438_s22  }
  0x22   :  { %430 = dma.done.wait [#allocation3], 128  }
  0x23   :  { %431 = vsyncadd [#allocation3], 4294967168 }
  0x24   :  { %432 = dma.done.wait [#allocation6], 2560  }
  0x25   :  { %433 = vsyncadd [#allocation6], 4294964736  ;;  %v441_v0 = vmov 0.0   ;;  %vm442_vm0 = vmmov 0   ;;  %v64_v1 = vld [vmem:[#allocation5 + $0x18] sm:$0xff]  ;;  %v63_v2 = vld [vmem:[#allocation5 + $0x10] sm:$0xff] }
  0x26   :  { %292 = vmatprep.subr.mxu0 %v441_v0  ;;  %300 = vmatprep.mubr.msk.f32.mxu0 %vm442_vm0, %v441_v0  ;;  %v161_v3 = vld [vmem:[#allocation7 + $0x78] sm:$0xff]  ;;  %v62_v4 = vld [vmem:[#allocation5 + $0x8] sm:$0xff]  ;;  %v160_v5 = vld [vmem:[#allocation7 + $0x70] sm:$0xff]  ;;  %vm72_vm1 = vcmask 261120  }
  0x27   :  { %303 = vmatprep.subr.mxu1 %v441_v0  ;;  %335 = vmatprep.mubr.msk.f32.mxu1 %vm442_vm0, %v441_v0  ;;  %v159_v6 = vld [vmem:[#allocation7 + $0x68] sm:$0xff]  ;;  %v61_v7 = vld [vmem:[#allocation5] sm:$0xff]  ;;  %v60_v8 = vld [vmem:[#allocation2] sm:$0xff] }
  0x28   :  { %293 = vmatpush3.msra.mxu0 %v64_v1  ;;  %304 = vmatpush3.msra.mxu1 %v161_v3  ;;  %v158_v9 = vld [vmem:[#allocation7 + $0x60] sm:$0xff]  ;;  %v157_v10 = vld [vmem:[#allocation7 + $0x58] sm:$0xff]  ;;  %v156_v11 = vld [vmem:[#allocation7 + $0x50] sm:$0xff] }
  0x29   :  { %294 = vmatprep.subr.mxu0 %v441_v0  ;;  %305 = vmatprep.subr.mxu1 %v441_v0  ;;  %v155_v12 = vld [vmem:[#allocation7 + $0x48] sm:$0xff]  ;;  %v154_v13 = vld [vmem:[#allocation7 + $0x40] sm:$0xff]  ;;  %v153_v14 = vld [vmem:[#allocation7 + $0x38] sm:$0xff] }
  0x2a   :  { %295 = vmatpush3.msra.mxu0 %v63_v2  ;;  %306 = vmatpush3.msra.mxu1 %v160_v5  ;;  %v152_v15 = vld [vmem:[#allocation7 + $0x30] sm:$0xff]  ;;  %v151_v16 = vld [vmem:[#allocation7 + $0x28] sm:$0xff]  ;;  %v150_v17 = vld [vmem:[#allocation7 + $0x20] sm:$0xff] }
  0x2b   :  { %296 = vmatprep.subr.mxu0 %v441_v0  ;;  %307 = vmatprep.subr.mxu1 %v441_v0  ;;  %v149_v18 = vld [vmem:[#allocation7 + $0x18] sm:$0xff]  ;;  %v148_v19 = vld [vmem:[#allocation7 + $0x10] sm:$0xff]  ;;  %v147_v20 = vld [vmem:[#allocation7 + $0x8] sm:$0xff] }
  0x2c   :  { %297 = vmatpush3.msra.mxu0 %v62_v4  ;;  %308 = vmatpush3.msra.mxu1 %v159_v6  ;;  %v146_v21 = vld [vmem:[#allocation7] sm:$0xff]  ;;  %v267_v22 = vld [vmem:[%s516_s2] ss:$0 sm:$0xff]  ;;  %s443_s2 = smov [#allocation8]  }
  0x2d   :  { %298 = vmatprep.subr.mxu0 %v441_v0  ;;  %309 = vmatprep.subr.mxu1 %v441_v0  ;;  %v269_v27 = vld [vmem:[%s518_s4] ss:$0 sm:$0xff]  ;;  %s257_s11 = sshll.u32 %s443_s2, 4  ;;  %s258_s11 = int_to_ptr.vmem [resolvable:$true] %s257_s11 }
  0x2e   :  { %299 = vmatpush3.msra.mxu0 %v61_v7  ;;  %310 = vmatpush3.msra.mxu1 %v158_v9  ;;  %s410_s12 = scalar_lea.vmem %s258_s11, 128  ;;  %p415_p2 = scmp.lt.s32.totalorder %s258_s11, %s258_s11 }
  0x2f   :  { %301 = vmatmul.mubr.msk.f32.vlgmr.msra.gmra.mxu0 %vm72_vm1, %v60_v8  ;;  %311 = vmatprep.subr.mxu1 %v441_v0  ;;  %p411_p1 = scmp.ne.s32.totalorder %s258_s11, %s410_s12  ;;  %p416_p3 = scmp.lt.s32.totalorder %s410_s12, %s410_s12 }
  0x30   :  { %312 = vmatpush3.msra.mxu1 %v157_v10 }
  0x31   :  { %313 = vmatprep.subr.mxu1 %v441_v0  ;;  %p417_p4 = por %p416_p3, %p415_p2 }
  0x32   :  { %314 = vmatpush3.msra.mxu1 %v156_v11 }
  0x33   :  { %315 = vmatprep.subr.mxu1 %v441_v0  ;;  %p418_p5 = pnand %p417_p4, %p411_p1 }
  0x34   :  { %316 = vmatpush3.msra.mxu1 %v155_v12 }
  0x35   :  { %317 = vmatprep.subr.mxu1 %v441_v0 }
  0x36   :  { %318 = vmatpush3.msra.mxu1 %v154_v13 }
  0x37   :  { %319 = vmatprep.subr.mxu1 %v441_v0 }
  0x38   :  { %320 = vmatpush3.msra.mxu1 %v153_v14 }
  0x39   :  { %321 = vmatprep.subr.mxu1 %v441_v0 }
  0x3a   :  { %322 = vmatpush3.msra.mxu1 %v152_v15 }
  0x3b   :  { %323 = vmatprep.subr.mxu1 %v441_v0 }
  0x3c   :  { %324 = vmatpush3.msra.mxu1 %v151_v16 }
  0x3d   :  { %325 = vmatprep.subr.mxu1 %v441_v0 }
  0x3e   :  { %326 = vmatpush3.msra.mxu1 %v150_v17 }
  0x3f   :  { %327 = vmatprep.subr.mxu1 %v441_v0 }
  0x40   :  { %328 = vmatpush3.msra.mxu1 %v149_v18 }
  0x41   :  { %329 = vmatprep.subr.mxu1 %v441_v0 }
  0x42   :  { %330 = vmatpush3.msra.mxu1 %v148_v19 }
  0x43   :  { %331 = vmatprep.subr.mxu1 %v441_v0 }
  0x44   :  { %332 = vmatpush3.msra.mxu1 %v147_v20 }
  0x45   :  { %333 = vmatprep.subr.mxu1 %v441_v0 }
  0x46   :  { %334 = vmatpush3.msra.mxu1 %v146_v21 }
  0xef   :  { %v142_v23 = vpop.f32.mrf.mxu0 }
  0xf0   :  { %v143_v24 = vadd.f32 %v267_v22, %v142_v23 }
  0xf1   :  { %v302_v25 = vpop.f32.mrf.mxu0 }
  0xf2   :  { %336 = vmatmul.mubr.f32.vlgmr.msra.gmra.mxu1 %v143_v24  ;;  %v232_v26 = vmul.f32 %v143_v24, %v143_v24 }
  0xf4   :  { %233 = vadd.xlane.f32.xlu0 %v232_v26 }
 0x17d   :  { %v234_v28 = vpop.xlane.xlu0 %233 }
 0x17e   :  { %v242_v29 = vadd.f32 %v269_v27, %v234_v28 }
 0x1b2   :  { %v228_v30 = vpop.f32.mrf.mxu1 }
 0x1b3   :  { %v243_v31 = vadd.f32 %v242_v29, %v228_v30 }
 0x1b4   :  { %v337_v32 = vpop.f32.mrf.mxu1 }
 0x1b5   :  { %v244_v33 = vmax.f32 %v243_v31, 1.0 }
 0x1b7   :  { %346 = vrcp.f32 %v244_v33 }
 0x1c4   :  { %v347_v34 = vpop.eup %346 }
 0x1c5   :  { %246 = vadd.xlane.f32.xlu0 %v347_v34 }
 0x24e   :  { %v247_v35 = vpop.xlane.xlu0 %246 }
 0x24f   :  { %348 = vrcp.f32 %v247_v35 }
 0x25c   :  { %v349_v36 = vpop.eup %348 }
 0x25d   :  { %v249_v37 = vmul.f32 %v349_v36, %v347_v34 }
 0x25f   :  { %250 = vst [vmem:[#allocation8] sm:$0xff] %v249_v37 }
 0x260   :  { %421 = shalt.err (!%p418_p5)
}
 0x261   :  { %260 = dma.vmem_to_hbm [thread:$0]  %s258_s11, 128, %s519_s5, [#allocation4]  }
 0x262   :  { %434 = dma.done.wait [#allocation4], 128  }
 0x263   :  { %435 = vsyncadd [#allocation4], 4294967168 }
 0x264   :  { %264 = vsyncpa [#allocation3], 1 }
 0x265   :  { %265 = vsyncpa [#allocation6], 1 }
 0x266   :  { %266 = vsyncpa [#allocation4], 1 }

</bundles_post_ra>
